<compile_context>
chip_gen: v6e
topology: v6e:2x2x1
jax: 0.10.0
libtpu: 0.0.40
codegen_flags: <defaults>
</compile_context>

<pallas_src>
import functools

import jax
import jax.numpy as jnp
from jax import lax
from jax.experimental import pallas as pl
from jax.experimental.pallas import tpu as pltpu

_LN2 = 0.6931471805599453


def jsd_block_kernel(p_ref, q_ref, o_ref, *, rows, tm, sub, bf16_logs):
    """One grid step: a (tm, W) tile of p / q -> a (sub, W) lane-dense partial sum."""
    p = p_ref[...].astype(jnp.float32)
    q = q_ref[...].astype(jnp.float32)

    if rows % tm != 0:
        # Only the ragged last block needs this; rows past `rows` hold
        # unspecified DMA fill.  p = q = 1 makes those terms exactly 0 and
        # keeps the logs NaN-free.  Full tilings never trace this branch.
        rid = pl.program_id(0) * tm + lax.broadcasted_iota(jnp.int32, (tm, 1), 0)
        valid = rid < rows
        p = jnp.where(valid, p, jnp.float32(1.0))
        q = jnp.where(valid, q, jnp.float32(1.0))

    s = p + q
    if bf16_logs:
        # Opt-in for v6e/v7x when the single EUP binds (e.g. bf16 inputs on
        # v7x): packed-bf16 log roughly doubles EUP throughput.  Multiplies
        # and accumulation stay in f32.  Do NOT enable on v5e (no bf16 EUP).
        lp = jnp.log(p.astype(jnp.bfloat16)).astype(jnp.float32)
        lq = jnp.log(q.astype(jnp.bfloat16)).astype(jnp.float32)
        ls = jnp.log(s.astype(jnp.bfloat16)).astype(jnp.float32)
    else:
        lp = jnp.log(p)
        lq = jnp.log(q)
        ls = jnp.log(s)

    # p*(log p - m) + q*(log q - m) with m = log(0.5*(p+q))
    #   = p*log p + q*log q - (p+q)*(log(p+q) - ln 2)     -> 3 logs / element.
    # NOTE: 0*log(0) -> NaN, matching torch.nn.KLDivLoss / the reference.
    term = p * lp + q * lq - s * (ls - jnp.float32(_LN2))

    if sub == 8:
        # Fold groups of 8 rows with plain VALU adds (sublane-split reshape is
        # a layout no-op) and emit a full (8, W) unmasked store.
        o_ref[...] = term.reshape(tm // 8, 8, term.shape[-1]).sum(axis=0)
    else:
        o_ref[...] = jnp.sum(term, axis=0, keepdims=True)


def _round_up(x, m):
    return ((x + m - 1) // m) * m


def jsd_pallas(p, q, masks, *, max_rows_per_block=1024, bf16_logs=False):
    """Forward JSD matching the PyTorch module."""
    total = p.size
    C = p.shape[-1]

    # Widest lane-dense W that divides the element count exactly -> reshapes
    # below are free; no pad / no extra HBM traffic.  Fallback: original C.
    for w in (512, 256, 128):
        if total % w == 0:
            W = w
            break
    else:
        W = C
    rows = total // W

    p2 = p.reshape(rows, W)   # dtype preserved; bf16 inputs halve HBM traffic
    q2 = q.reshape(rows, W)

    # Row tiling: <= max_rows_per_block rows per block (2 MiB f32 tiles at
    # W=512; fits default scoped VMEM with double-buffering on all chips),
    # and >= 2 blocks whenever possible so both v7x TensorCores get work.
    if rows <= 8:
        tm = rows                                            # single tiny block
    else:
        tm = min(max_rows_per_block, _round_up(pl.cdiv(rows, 2), 8))
    num_blocks = pl.cdiv(rows, tm)
    sub = 8 if tm % 8 == 0 else 1                            # partial rows/block

    partial = pl.pallas_call(
        functools.partial(jsd_block_kernel, rows=rows, tm=tm, sub=sub,
                          bf16_logs=bf16_logs),
        out_shape=jax.ShapeDtypeStruct((num_blocks * sub, W), jnp.float32),
        grid=(num_blocks,),
        in_specs=[
            pl.BlockSpec((tm, W), lambda i: (i, 0)),   # p tile
            pl.BlockSpec((tm, W), lambda i: (i, 0)),   # q tile
        ],
        out_specs=pl.BlockSpec((sub, W), lambda i: (i, 0)),
        compiler_params=pltpu.CompilerParams(
            dimension_semantics=("parallel",),
        ),
    )(p2, q2)

    # Tiny final glue in plain JAX: cross-block/lane reduce + scaling.
    denom = jnp.maximum(jnp.float32(1e-6), jnp.sum(masks.astype(jnp.float32)))
    return 0.5 * jnp.sum(partial) / denom


def jsd_ref(p, q, masks):
    C = p.shape[-1]
    p2 = p.reshape(-1, C).astype(jnp.float32)
    q2 = q.reshape(-1, C).astype(jnp.float32)
    m = jnp.log(0.5 * (p2 + q2))
    kl_pm = p2 * (jnp.log(p2) - m)
    kl_qm = q2 * (jnp.log(q2) - m)
    return 0.5 * jnp.sum(kl_pm + kl_qm) / jnp.maximum(
        1e-6, jnp.sum(masks.astype(jnp.float32)))


if __name__ == "__main__":
    key = jax.random.PRNGKey(0)
    k1, k2, k3 = jax.random.split(key, 3)

    # Primary small case consistent with the module: batch=2, seq=8, classes=32.
    B, S, C = 2, 8, 32
    p = jax.nn.softmax(jax.random.normal(k1, (B, S, C), jnp.float32), axis=-1)
    q = jax.nn.softmax(jax.random.normal(k2, (B, S, C), jnp.float32), axis=-1)
    masks = (jax.random.uniform(k3, (B, S)) > 0.3).astype(jnp.float32)

    out = jax.block_until_ready(jsd_pallas(p, q, masks))
    ref = jsd_ref(p, q, masks)
    assert jnp.allclose(out, ref, rtol=1e-5, atol=1e-6), (out, ref)

    # Second small case exercising the multi-block / ragged-last-block /
    # (8, W)-partial path (total=3840 -> W=256, rows=15, 2 blocks of 8 rows).
    k4, k5, k6 = jax.random.split(jax.random.PRNGKey(1), 3)
    B2, S2, C2 = 2, 20, 96
    pb = jax.nn.softmax(jax.random.normal(k4, (B2, S2, C2), jnp.float32), axis=-1)
    qb = jax.nn.softmax(jax.random.normal(k5, (B2, S2, C2), jnp.float32), axis=-1)
    masksb = (jax.random.uniform(k6, (B2, S2)) > 0.3).astype(jnp.float32)

    outb = jax.block_until_ready(jsd_pallas(pb, qb, masksb))
    refb = jsd_ref(pb, qb, masksb)
    assert jnp.allclose(outb, refb, rtol=1e-5, atol=1e-6), (outb, refb)

    print("KERNEL_OK")
</pallas_src>

<mosaic_0001>
module attributes {stable_mosaic.version = 11 : i64} {
  func.func @jsd_block_kernel(%arg0: i32, %arg1: memref<1x512xf32, #tpu.memory_space<vmem>>, %arg2: memref<1x512xf32, #tpu.memory_space<vmem>>, %arg3: memref<1x512xf32, #tpu.memory_space<vmem>>) attributes {dimension_semantics = [#tpu.dimension_semantics<parallel>], iteration_bounds = array<i64: 1>, scalar_prefetch = 0 : i64, scratch_operands = 0 : i64, tpu.core_type = #tpu.core_type<tc>, window_params = [{transform_indices = @transform_0, window_bounds = array<i64: 1, 512>}, {transform_indices = @transform_1, window_bounds = array<i64: 1, 512>}, {transform_indices = @transform_2, window_bounds = array<i64: 1, 512>}]} {
    %c0 = arith.constant 0 : index
    %c0_0 = arith.constant 0 : index
    %0 = vector.load %arg1[%c0, %c0_0] : memref<1x512xf32, #tpu.memory_space<vmem>>, vector<1x512xf32>
    %c0_1 = arith.constant 0 : index
    %c0_2 = arith.constant 0 : index
    %1 = vector.load %arg2[%c0_1, %c0_2] : memref<1x512xf32, #tpu.memory_space<vmem>>, vector<1x512xf32>
    %2 = arith.addf %0, %1 : vector<1x512xf32>
    %3 = math.log %0 : vector<1x512xf32>
    %4 = math.log %1 : vector<1x512xf32>
    %5 = math.log %2 : vector<1x512xf32>
    %6 = arith.mulf %0, %3 : vector<1x512xf32>
    %7 = arith.mulf %1, %4 : vector<1x512xf32>
    %8 = arith.addf %6, %7 : vector<1x512xf32>
    %cst = arith.constant 0.693147182 : f32
    %9 = vector.broadcast %cst : f32 to vector<1x512xf32>
    %10 = arith.subf %5, %9 : vector<1x512xf32>
    %11 = arith.mulf %2, %10 : vector<1x512xf32>
    %12 = arith.subf %8, %11 : vector<1x512xf32>
    %cst_3 = arith.constant dense<0.000000e+00> : vector<512xf32>
    %13 = vector.multi_reduction <add>, %12, %cst_3 [0] : vector<1x512xf32> to vector<512xf32>
    %14 = vector.shape_cast %13 : vector<512xf32> to vector<1x512xf32>
    %c0_4 = arith.constant 0 : index
    %c0_5 = arith.constant 0 : index
    %15 = vector.load %arg3[%c0_4, %c0_5] : memref<1x512xf32, #tpu.memory_space<vmem>>, vector<1x512xf32>
    tpu.vector_store %arg3[%c0_4, %c0_5], %14 {strides = array<i32>} : memref<1x512xf32, #tpu.memory_space<vmem>>, vector<1x512xf32>,
    return
  }
  func.func @transform_0(%arg0: i32) -> (i32, i32) {
    %c0_i32 = arith.constant 0 : i32
    %c0_i32_0 = arith.constant 0 : i32
    return %arg0, %c0_i32 : i32, i32
  }
  func.func @transform_1(%arg0: i32) -> (i32, i32) {
    %c0_i32 = arith.constant 0 : i32
    %c0_i32_0 = arith.constant 0 : i32
    return %arg0, %c0_i32 : i32, i32
  }
  func.func @transform_2(%arg0: i32) -> (i32, i32) {
    %c0_i32 = arith.constant 0 : i32
    %c0_i32_0 = arith.constant 0 : i32
    return %arg0, %c0_i32 : i32, i32
  }
}

</mosaic_0001>

<bundles_post_ra>
// kernel: tpu_custom_call.1
= control target key start
LH: loop header
LB: loop body
LE: loop exit
PB: predicated region body
PF: predicated region fallthrough
CT: control target
= control target key end

     0   :  { %7 = vsyncpa [#allocation3], 0  ;;  %s176_s0 = inlined_call_operand.hbm [shape: f32[1,512], index: 0, kind: input, shape index: {}]   ;;  %s177_s1 = inlined_call_operand.hbm [shape: f32[1,512], index: 1, kind: input, shape index: {}]   ;;  %s178_s2 = inlined_call_operand.hbm [shape: f32[1,512], index: 2, kind: output, shape index: {}]  }
   0x1   :  { %8 = vsyncpa [#allocation6], 0 }
   0x2   :  { %9 = vsyncpa [#allocation4], 0  ;;  %s149_s9 = smov [#allocation2]   ;;  %s150_s11 = smov [#allocation5]  }
   0x3   :  { %s16_s10 = sshll.u32 %s149_s9, 4  ;;  %s26_s12 = sshll.u32 %s150_s11, 4  ;;  %s17_s10 = int_to_ptr.vmem [resolvable:$true] %s16_s10  ;;  %s27_s12 = int_to_ptr.vmem [resolvable:$true] %s26_s12 }
   0x4   :  { %s91_s13 = scalar_lea.vmem %s17_s10, 64  ;;  %p96_p1 = scmp.lt.s32.totalorder %s17_s10, %s17_s10 }
   0x5   :  { %p92_p0 = scmp.ne.s32.totalorder %s17_s10, %s91_s13  ;;  %p97_p2 = scmp.lt.s32.totalorder %s91_s13, %s91_s13 }
   0x7   :  { %p98_p3 = por %p97_p2, %p96_p1 }
   0x9   :  { %p99_p4 = pnand %p98_p3, %p92_p0 }
   0xb   :  { %102 = shalt.err (!%p99_p4)
}
   0xc   :  { %19 = dma.hbm_to_vmem [thread:$0]  %s176_s0, 64, %s17_s10, [#allocation3]  }
   0xd   :  { %s111_s16 = scalar_lea.vmem %s27_s12, 64  ;;  %p116_p6 = scmp.lt.s32.totalorder %s27_s12, %s27_s12 }
   0xe   :  { %p112_p5 = scmp.ne.s32.totalorder %s27_s12, %s111_s16  ;;  %p117_p7 = scmp.lt.s32.totalorder %s111_s16, %s111_s16 }
  0x10   :  { %p118_p8 = por %p117_p7, %p116_p6 }
  0x12   :  { %p119_p9 = pnand %p118_p8, %p112_p5 }
  0x14   :  { %122 = shalt.err (!%p119_p9)
}
  0x15   :  { %29 = dma.hbm_to_vmem [thread:$0]  %s177_s1, 64, %s27_s12, [#allocation6]  }
  0x16   :  { %143 = dma.done.wait [#allocation3], 64  }
  0x17   :  { %144 = vsyncadd [#allocation3], 4294967232 }
  0x18   :  { %145 = dma.done.wait [#allocation6], 64  }
  0x19   :  { %146 = vsyncadd [#allocation6], 4294967232  ;;  %v36_v0 = vld [vmem:[#allocation2] sm:$0xf]  ;;  %v37_v1 = vld [vmem:[#allocation5] sm:$0xf]  ;;  %v52_v11 = vlaneseq }
  0x1a   :  { %v38_v2 = vadd.f32 %v37_v1, %v36_v0  ;;  %77 = vlog2.f32 %v36_v0  ;;  %s151_s0 = smov [#allocation7]  }
  0x1b   :  { %79 = vlog2.f32 %v37_v1  ;;  %s63_s1 = sshll.u32 %s151_s0, 4  ;;  %vm54_vm0 = vcmp.lt.s32.totalorder %v52_v11, 512  ;;  %s64_s1 = int_to_ptr.vmem [resolvable:$true] %s63_s1 }
  0x1c   :  { %81 = vlog2.f32 %v38_v2  ;;  %s123_s19 = scalar_lea.vmem %s64_s1, 64  ;;  %p128_p11 = scmp.lt.s32.totalorder %s64_s1, %s64_s1 }
  0x1d   :  { %p124_p10 = scmp.ne.s32.totalorder %s64_s1, %s123_s19  ;;  %p129_p12 = scmp.lt.s32.totalorder %s123_s19, %s123_s19 }
  0x1f   :  { %p130_p13 = por %p129_p12, %p128_p11 }
  0x21   :  { %p131_p0 = pnand %p130_p13, %p124_p10 }
  0x27   :  { %v78_v3 = vpop.eup %77 }
  0x28   :  { %v80_v4 = vpop.eup %79  ;;  %v40_v5 = vmul.f32 0.6931472, %v78_v3 }
  0x29   :  { %v82_v6 = vpop.eup %81  ;;  %v42_v7 = vmul.f32 0.6931472, %v80_v4 }
  0x2a   :  { %v44_v8 = vmul.f32 0.6931472, %v82_v6  ;;  %v45_v9 = vmul.f32 %v40_v5, %v36_v0 }
  0x2b   :  { %v46_v10 = vmul.f32 %v42_v7, %v37_v1 }
  0x2c   :  { %v73_v12 = vadd.f32 -0.6931472, %v44_v8 }
  0x2d   :  { %v47_v13 = vadd.f32 %v46_v10, %v45_v9 }
  0x2e   :  { %v49_v14 = vmul.f32 %v73_v12, %v38_v2 }
  0x30   :  { %v50_v15 = vsub.f32 %v47_v13, %v49_v14 }
  0x32   :  { %56 = vst.msk [vmem:[#allocation7] sm:$0xf] %vm54_vm0, %v50_v15 }
  0x33   :  { %134 = shalt.err (!%p131_p0)
}
  0x34   :  { %66 = dma.vmem_to_hbm [thread:$0]  %s64_s1, 64, %s178_s2, [#allocation4]  }
  0x35   :  { %147 = dma.done.wait [#allocation4], 64  }
  0x36   :  { %148 = vsyncadd [#allocation4], 4294967232 }
  0x37   :  { %70 = vsyncpa [#allocation3], 1 }
  0x38   :  { %71 = vsyncpa [#allocation6], 1 }
  0x39   :  { %72 = vsyncpa [#allocation4], 1 }

</bundles_post_ra>
